<compile_context>
chip_gen: v7x
topology: tpu7x:2x2x1
jax: 0.10.0
libtpu: 0.0.40
codegen_flags: <defaults>
</compile_context>

<pallas_src>
import functools

import jax
import jax.numpy as jnp
from jax import lax
from jax.experimental import pallas as pl
from jax.experimental.pallas import tpu as pltpu

F32 = jnp.float32
BF16 = jnp.bfloat16
NEG_SLOPE = 0.2      # PyG GATConv default negative_slope
MASK_BIAS = -1e30    # additive mask for non-edges


# ----------------------------- Pallas kernels --------------------------------

def _proj1_kernel(x_ref, ew_ref, eb_ref, w1_ref, emb_ref, hh1_ref, *,
                  heads, hidden):
    """emb = Linear(x); hh1 = emb @ W1, stored head-major [heads, TM, hidden]."""
    emb = jnp.dot(x_ref[...].astype(BF16), ew_ref[...],
                  preferred_element_type=F32) + eb_ref[...]
    emb_ref[...] = emb
    # dropout(p=0.6) on emb: identity in eval mode.
    # One wide MXU projection for all heads, then a one-time head-major split so
    # the attention kernels never take sub-128-lane slices per row tile.
    hh = jnp.dot(emb.astype(BF16), w1_ref[...], preferred_element_type=F32)
    hhb = hh.astype(BF16)
    for hd in range(heads):                       # static, tiny per-tile cost
        hh1_ref[hd] = hhb[:, hd * hidden:(hd + 1) * hidden]


def _head_attention(hh_ref, asrc, adst, bias, ones_col, row0, tm, hd):
    """Masked-softmax attention for one head over one target-row tile.

    hh_ref   : [heads, N, fout] bf16 source features (head-major, full graph)
    asrc/adst: [heads, fout] bf16 attention vectors (loaded values)
    bias     : [TM, N] f32 additive mask (0 on edges incl. self loops)
    Returns the normalized aggregation [TM, fout] (f32).
    """
    hh_h = hh_ref[hd]                                                 # [N, fout]
    asrc_h = lax.dynamic_slice_in_dim(asrc, hd, 1, axis=0)            # [1, fout]
    adst_h = lax.dynamic_slice_in_dim(adst, hd, 1, axis=0)            # [1, fout]
    a_src = lax.dot_general(asrc_h, hh_h, (((1,), (1,)), ((), ())),
                            preferred_element_type=F32)               # [1, N]
    hh_t = lax.dynamic_slice_in_dim(hh_h, row0, tm, axis=0)           # [TM, fout]
    a_dst = lax.dot_general(hh_t, adst_h, (((1,), (1,)), ((), ())),
                            preferred_element_type=F32)               # [TM, 1]

    e = a_dst + a_src + bias                                          # [TM, N]
    e = jnp.where(e > 0, e, NEG_SLOPE * e)                            # LeakyReLU
    m = jnp.max(e, axis=1, keepdims=True)                             # row max
    p = jnp.exp(e - m)                                                # 0 off-graph
    # TODO(synk): attention-coefficient dropout (p=0.6) skipped — eval mode.
    pb = p.astype(BF16)
    # Row-sum folded into the MXU (not an XLU cross-lane reduce).
    denom = jnp.dot(pb, ones_col, preferred_element_type=F32)         # [TM, 1]
    agg = jnp.dot(pb, hh_h, preferred_element_type=F32)               # [TM, fout]
    return agg * pl.reciprocal(denom, approx=True)


def _layer1_kernel(bias_ref, hh1_ref, asrc_ref, adst_ref, b1_ref, w2_ref,
                   hh2_ref, *, heads, ncls, tm):
    """Attention layer 1 (concat) + ELU, fused with conv2's lin projection.

    Output: hh2 = elu(conv1(.)) @ W2, stored head-major [heads, TM, ncls] bf16.
    """
    row0 = pl.multiple_of(pl.program_id(0) * tm, tm)
    bias = bias_ref[...].astype(F32)          # bf16 in HBM; upcast once per tile
    n = bias.shape[1]
    ones_col = jnp.ones((n, 1), BF16)
    asrc = asrc_ref[...]
    adst = adst_ref[...]
    b1 = b1_ref[...]                          # [heads, hidden] f32
    k2 = heads * ncls

    def head_body(hd, acc):
        h1_h = _head_attention(hh1_ref, asrc, adst, bias, ones_col, row0, tm, hd)
        h1_h = h1_h + lax.dynamic_slice_in_dim(b1, hd, 1, axis=0)     # + bias_1
        h1_h = jnp.where(h1_h > 0, h1_h, jnp.exp(h1_h) - 1.0)         # ELU
        # dropout(p=0.6) on h1: identity in eval mode.
        # conv2 lin projection folded in: hh2 += h1[head block] @ W2[head block].
        return acc + jnp.dot(h1_h.astype(BF16), w2_ref[hd],
                             preferred_element_type=F32)

    hh2 = lax.fori_loop(0, heads, head_body, jnp.zeros((tm, k2), F32))
    hh2b = hh2.astype(BF16)
    for h2 in range(heads):                   # static head-major split for layer 2
        hh2_ref[h2] = hh2b[:, h2 * ncls:(h2 + 1) * ncls]


def _layer2_kernel(bias_ref, hh2_ref, asrc_ref, adst_ref, b2_ref, logp_ref, *,
                   heads, ncls, tm):
    """Attention layer 2 (concat=False -> mean over heads) + log_softmax."""
    row0 = pl.multiple_of(pl.program_id(0) * tm, tm)
    bias = bias_ref[...].astype(F32)
    n = bias.shape[1]
    ones_col = jnp.ones((n, 1), BF16)
    asrc = asrc_ref[...]
    adst = adst_ref[...]

    def head_body(hd, acc):
        return acc + _head_attention(hh2_ref, asrc, adst, bias, ones_col,
                                     row0, tm, hd)

    out = lax.fori_loop(0, heads, head_body, jnp.zeros((tm, ncls), F32))
    out = out * (1.0 / heads) + b2_ref[...]              # mean over heads + bias

    # log_softmax fused in; the [TM, ncls] tile never round-trips HBM raw.
    m = jnp.max(out, axis=1, keepdims=True)
    s = out - m
    lse = jnp.log(jnp.sum(jnp.exp(s), axis=1, keepdims=True))
    logp_ref[...] = s - lse


# ------------------------------ JAX wrapper ----------------------------------

def _pick_row_tile(n, preferred=128):
    # Prefer 128 (v5e MXU-aligned); on v6e/v7x sweep up to 256+ while VMEM fits.
    # TODO(synk): pad/mask the ragged last tile when N % tile != 0.
    if n >= preferred and n % preferred == 0:
        return preferred
    return n


def gat_forward(params, x, adj, *, heads, row_tile=None):
    n, fin = x.shape
    hidden = params["emb_b"].shape[0]
    ncls = params["b2"].shape[0]
    tm = row_tile or _pick_row_tile(n)
    assert n % tm == 0
    nt = n // tm

    # Additive attention mask (0 on edges incl. self loops, -1e30 elsewhere),
    # stored bf16: halves the dominant O(N^2) HBM traffic and removes the
    # per-head cmp+select on the [TM, N] path.
    bias = jnp.where(adj > 0, 0.0, MASK_BIAS).astype(BF16)

    emb_w = params["emb_w_t"].astype(BF16)                       # [fin, hidden]
    emb_b = params["emb_b"].reshape(1, hidden)
    w1 = params["w1_t"].astype(BF16)                             # [hidden, H*hidden]
    w2 = params["w2_t"].reshape(heads, hidden, heads * ncls).astype(BF16)
    asrc1 = params["att_src1"].astype(BF16)                      # [heads, hidden]
    adst1 = params["att_dst1"].astype(BF16)
    asrc2 = params["att_src2"].astype(BF16)                      # [heads, ncls]
    adst2 = params["att_dst2"].astype(BF16)
    b1 = params["b1"].reshape(heads, hidden)                     # f32
    b2 = params["b2"].reshape(1, ncls)                           # f32

    par = pltpu.CompilerParams(dimension_semantics=("parallel",))

    def full_spec(shape):
        nd = len(shape)
        return pl.BlockSpec(shape, lambda i, nd=nd: (0,) * nd)

    # ---- pass 1: emb = Linear(x); hh1 (head-major, bf16) ----
    emb, hh1 = pl.pallas_call(
        functools.partial(_proj1_kernel, heads=heads, hidden=hidden),
        grid=(nt,),
        in_specs=[
            pl.BlockSpec((tm, fin), lambda i: (i, 0)),
            full_spec((fin, hidden)),
            full_spec((1, hidden)),
            full_spec((hidden, heads * hidden)),
        ],
        out_specs=(
            pl.BlockSpec((tm, hidden), lambda i: (i, 0)),
            pl.BlockSpec((heads, tm, hidden), lambda i: (0, i, 0)),
        ),
        out_shape=(
            jax.ShapeDtypeStruct((n, hidden), F32),
            jax.ShapeDtypeStruct((heads, n, hidden), BF16),
        ),
        compiler_params=par,
    )(x, emb_w, emb_b, w1)

    # ---- pass 2: attention layer 1 + ELU, fused with conv2 lin projection ----
    hh2 = pl.pallas_call(
        functools.partial(_layer1_kernel, heads=heads, ncls=ncls, tm=tm),
        grid=(nt,),
        in_specs=[
            pl.BlockSpec((tm, n), lambda i: (i, 0)),     # bias row tile
            full_spec((heads, n, hidden)),               # hh1 (all sources)
            full_spec((heads, hidden)),                  # att_src1
            full_spec((heads, hidden)),                  # att_dst1
            full_spec((heads, hidden)),                  # b1 (head-major)
            full_spec((heads, hidden, heads * ncls)),    # W2 (input-head-major)
        ],
        out_specs=pl.BlockSpec((heads, tm, ncls), lambda i: (0, i, 0)),
        out_shape=jax.ShapeDtypeStruct((heads, n, ncls), BF16),
        compiler_params=par,
    )(bias, hh1, asrc1, adst1, b1, w2)

    # ---- pass 3: attention layer 2 (mean over heads) + log_softmax ----
    logp = pl.pallas_call(
        functools.partial(_layer2_kernel, heads=heads, ncls=ncls, tm=tm),
        grid=(nt,),
        in_specs=[
            pl.BlockSpec((tm, n), lambda i: (i, 0)),     # bias row tile
            full_spec((heads, n, ncls)),                 # hh2 (all sources)
            full_spec((heads, ncls)),                    # att_src2
            full_spec((heads, ncls)),                    # att_dst2
            full_spec((1, ncls)),                        # b2
        ],
        out_specs=pl.BlockSpec((tm, ncls), lambda i: (i, 0)),
        out_shape=jax.ShapeDtypeStruct((n, ncls), F32),
        compiler_params=par,
    )(bias, hh2, asrc2, adst2, b2)

    return emb, logp


# ---------------------------- pure-JAX reference -----------------------------

def _gat_reference(params, x, adj, *, heads):
    hidden = params["emb_b"].shape[0]
    ncls = params["b2"].shape[0]
    emb = x @ params["emb_w_t"] + params["emb_b"]

    def layer(h, w_t, att_src, att_dst, b, fout, concat):
        hh = h @ w_t
        outs = []
        for hd in range(heads):
            hh_h = hh[:, hd * fout:(hd + 1) * fout]
            a_src = hh_h @ att_src[hd]
            a_dst = hh_h @ att_dst[hd]
            e = a_dst[:, None] + a_src[None, :]
            e = jnp.where(e > 0, e, NEG_SLOPE * e)
            e = jnp.where(adj > 0, e, -jnp.inf)
            a = jax.nn.softmax(e, axis=1)
            outs.append(a @ hh_h)
        if concat:
            return jnp.concatenate(outs, axis=1) + b
        return sum(outs) / heads + b

    h1 = jax.nn.elu(layer(emb, params["w1_t"], params["att_src1"],
                          params["att_dst1"], params["b1"], hidden, True))
    h2 = layer(h1, params["w2_t"], params["att_src2"], params["att_dst2"],
               params["b2"], ncls, False)
    return emb, jax.nn.log_softmax(h2, axis=1)


# --------------------------------- main --------------------------------------

def _init_params(key, in_ch, hidden, n_classes, heads):
    ks = jax.random.split(key, 10)
    s = 0.1
    return {
        # nn.Linear(in_ch, hidden): weight [hidden, in_ch] -> stored transposed
        "emb_w_t": jax.random.normal(ks[0], (in_ch, hidden), F32) * s,
        "emb_b": jax.random.normal(ks[1], (hidden,), F32) * s,
        # GATConv(hidden, hidden, heads): lin weight [heads*hidden, hidden] -> T
        "w1_t": jax.random.normal(ks[2], (hidden, heads * hidden), F32) * s,
        "att_src1": jax.random.normal(ks[3], (heads, hidden), F32) * s,
        "att_dst1": jax.random.normal(ks[4], (heads, hidden), F32) * s,
        "b1": jax.random.normal(ks[5], (heads * hidden,), F32) * s,
        # GATConv(hidden*heads, n_classes, heads, concat=False)
        "w2_t": jax.random.normal(ks[6], (hidden * heads, heads * n_classes),
                                  F32) * s,
        "att_src2": jax.random.normal(ks[7], (heads, n_classes), F32) * s,
        "att_dst2": jax.random.normal(ks[8], (heads, n_classes), F32) * s,
        "b2": jax.random.normal(ks[9], (n_classes,), F32) * s,
    }


if __name__ == "__main__":
    N, IN_CH, HIDDEN, N_CLASSES, HEADS = 256, 8, 32, 4, 5

    key = jax.random.PRNGKey(0)
    kx, kp, ke = jax.random.split(key, 3)

    # data.x : node features [N, in_channels]
    x = jax.random.normal(kx, (N, IN_CH), F32)

    # data.edge_index : bidirectional ring + random chords, shape [2, E]
    src = jnp.arange(N, dtype=jnp.int32)
    dst = (src + 1) % N
    rsrc = jax.random.randint(ke, (N,), 0, N)
    rdst = jax.random.randint(jax.random.fold_in(ke, 1), (N,), 0, N)
    edge_src = jnp.concatenate([src, dst, rsrc, rdst])
    edge_dst = jnp.concatenate([dst, src, rdst, rsrc])

    # dense adjacency with self loops: adj[target, source] = 1
    adj = jnp.zeros((N, N), F32).at[edge_dst, edge_src].set(1.0)
    adj = jnp.maximum(adj, jnp.eye(N, dtype=F32))

    params = _init_params(kp, IN_CH, HIDDEN, N_CLASSES, HEADS)

    emb, logp = gat_forward(params, x, adj, heads=HEADS)
    jax.block_until_ready((emb, logp))

    assert emb.shape == (N, HIDDEN)
    assert logp.shape == (N, N_CLASSES)
    # log_softmax rows should sum (in prob space) to ~1 and be finite
    assert jnp.allclose(jnp.exp(logp).sum(axis=1), 1.0, atol=1e-4)
    assert bool(jnp.all(jnp.isfinite(logp)))

    # loose-tolerance check vs f32 reference (kernel uses bf16 MXU feeds + approx
    # reciprocal in the softmax normalization)
    emb_ref, logp_ref = _gat_reference(params, x, adj, heads=HEADS)
    assert float(jnp.max(jnp.abs(emb - emb_ref))) < 5e-2
    assert float(jnp.max(jnp.abs(logp - logp_ref))) < 5e-2

    print("KERNEL_OK")
</pallas_src>

<mosaic_0001>
module attributes {stable_mosaic.version = 11 : i64} {
  func.func @_proj1_kernel(%arg0: i32, %arg1: memref<128x8xf32, #tpu.memory_space<vmem>>, %arg2: memref<8x32xbf16, #tpu.memory_space<vmem>>, %arg3: memref<1x32xf32, #tpu.memory_space<vmem>>, %arg4: memref<32x160xbf16, #tpu.memory_space<vmem>>, %arg5: memref<128x32xf32, #tpu.memory_space<vmem>>, %arg6: memref<5x128x32xbf16, #tpu.memory_space<vmem>>) attributes {dimension_semantics = [#tpu.dimension_semantics<parallel>], iteration_bounds = array<i64: 2>, scalar_prefetch = 0 : i64, scratch_operands = 0 : i64, tpu.core_type = #tpu.core_type<tc>, window_params = [{transform_indices = @transform_0, window_bounds = array<i64: 128, 8>}, {pipeline_mode = #tpu.pipeline_mode<synchronous>, transform_indices = @transform_1, window_bounds = array<i64: 8, 32>}, {pipeline_mode = #tpu.pipeline_mode<synchronous>, transform_indices = @transform_2, window_bounds = array<i64: 1, 32>}, {pipeline_mode = #tpu.pipeline_mode<synchronous>, transform_indices = @transform_3, window_bounds = array<i64: 32, 160>}, {transform_indices = @transform_4, window_bounds = array<i64: 128, 32>}, {transform_indices = @transform_5, window_bounds = array<i64: 5, 128, 32>}]} {
    %c0 = arith.constant 0 : index
    %c0_0 = arith.constant 0 : index
    %0 = vector.load %arg1[%c0, %c0_0] : memref<128x8xf32, #tpu.memory_space<vmem>>, vector<128x8xf32>
    %1 = arith.truncf %0 : vector<128x8xf32> to vector<128x8xbf16>
    %c0_1 = arith.constant 0 : index
    %c0_2 = arith.constant 0 : index
    %2 = vector.load %arg2[%c0_1, %c0_2] : memref<8x32xbf16, #tpu.memory_space<vmem>>, vector<8x32xbf16>
    %cst = arith.constant dense<0.000000e+00> : vector<128x32xf32>
    %3 = tpu.matmul %1, %2, %cst {dimension_numbers = #tpu.dot_dimension_numbers<[1], [0], [0], [1], [0, 0, 1, 1], [], []>} : vector<128x8xbf16>, vector<8x32xbf16>, vector<128x32xf32> -> vector<128x32xf32>
    %c0_3 = arith.constant 0 : index
    %c0_4 = arith.constant 0 : index
    %4 = vector.load %arg3[%c0_3, %c0_4] : memref<1x32xf32, #tpu.memory_space<vmem>>, vector<1x32xf32>
    %5 = vector.broadcast %4 : vector<1x32xf32> to vector<128x32xf32>
    %6 = arith.addf %3, %5 : vector<128x32xf32>
    %c0_5 = arith.constant 0 : index
    %c0_6 = arith.constant 0 : index
    %7 = vector.load %arg5[%c0_5, %c0_6] : memref<128x32xf32, #tpu.memory_space<vmem>>, vector<128x32xf32>
    tpu.vector_store %arg5[%c0_5, %c0_6], %6 {strides = array<i32>} : memref<128x32xf32, #tpu.memory_space<vmem>>, vector<128x32xf32>,
    %8 = arith.truncf %6 : vector<128x32xf32> to vector<128x32xbf16>
    %c0_7 = arith.constant 0 : index
    %c0_8 = arith.constant 0 : index
    %9 = vector.load %arg4[%c0_7, %c0_8] : memref<32x160xbf16, #tpu.memory_space<vmem>>, vector<32x160xbf16>
    %cst_9 = arith.constant dense<0.000000e+00> : vector<128x160xf32>
    %10 = tpu.matmul %8, %9, %cst_9 {dimension_numbers = #tpu.dot_dimension_numbers<[1], [0], [0], [1], [0, 0, 1, 1], [], []>} : vector<128x32xbf16>, vector<32x160xbf16>, vector<128x160xf32> -> vector<128x160xf32>
    %11 = arith.truncf %10 : vector<128x160xf32> to vector<128x160xbf16>
    %12 = vector.extract_strided_slice %11 {offsets = [0, 0], sizes = [128, 32], strides = [1, 1]} : vector<128x160xbf16> to vector<128x32xbf16>
    %c0_10 = arith.constant 0 : index
    %c0_11 = arith.constant 0 : index
    %c0_12 = arith.constant 0 : index
    %13 = vector.load %arg6[%c0_10, %c0_11, %c0_12] : memref<5x128x32xbf16, #tpu.memory_space<vmem>>, vector<1x128x32xbf16>
    %14 = vector.shape_cast %13 : vector<1x128x32xbf16> to vector<128x32xbf16>
    %15 = vector.shape_cast %12 : vector<128x32xbf16> to vector<1x128x32xbf16>
    tpu.vector_store %arg6[%c0_10, %c0_11, %c0_12], %15 {strides = array<i32>} : memref<5x128x32xbf16, #tpu.memory_space<vmem>>, vector<1x128x32xbf16>,
    %16 = vector.extract_strided_slice %11 {offsets = [0, 32], sizes = [128, 32], strides = [1, 1]} : vector<128x160xbf16> to vector<128x32xbf16>
    %c1 = arith.constant 1 : index
    %c0_13 = arith.constant 0 : index
    %c0_14 = arith.constant 0 : index
    %17 = vector.load %arg6[%c1, %c0_13, %c0_14] : memref<5x128x32xbf16, #tpu.memory_space<vmem>>, vector<1x128x32xbf16>
    %18 = vector.shape_cast %17 : vector<1x128x32xbf16> to vector<128x32xbf16>
    %19 = vector.shape_cast %16 : vector<128x32xbf16> to vector<1x128x32xbf16>
    tpu.vector_store %arg6[%c1, %c0_13, %c0_14], %19 {strides = array<i32>} : memref<5x128x32xbf16, #tpu.memory_space<vmem>>, vector<1x128x32xbf16>,
    %20 = vector.extract_strided_slice %11 {offsets = [0, 64], sizes = [128, 32], strides = [1, 1]} : vector<128x160xbf16> to vector<128x32xbf16>
    %c2 = arith.constant 2 : index
    %c0_15 = arith.constant 0 : index
    %c0_16 = arith.constant 0 : index
    %21 = vector.load %arg6[%c2, %c0_15, %c0_16] : memref<5x128x32xbf16, #tpu.memory_space<vmem>>, vector<1x128x32xbf16>
    %22 = vector.shape_cast %21 : vector<1x128x32xbf16> to vector<128x32xbf16>
    %23 = vector.shape_cast %20 : vector<128x32xbf16> to vector<1x128x32xbf16>
    tpu.vector_store %arg6[%c2, %c0_15, %c0_16], %23 {strides = array<i32>} : memref<5x128x32xbf16, #tpu.memory_space<vmem>>, vector<1x128x32xbf16>,
    %24 = vector.extract_strided_slice %11 {offsets = [0, 96], sizes = [128, 32], strides = [1, 1]} : vector<128x160xbf16> to vector<128x32xbf16>
    %c3 = arith.constant 3 : index
    %c0_17 = arith.constant 0 : index
    %c0_18 = arith.constant 0 : index
    %25 = vector.load %arg6[%c3, %c0_17, %c0_18] : memref<5x128x32xbf16, #tpu.memory_space<vmem>>, vector<1x128x32xbf16>
    %26 = vector.shape_cast %25 : vector<1x128x32xbf16> to vector<128x32xbf16>
    %27 = vector.shape_cast %24 : vector<128x32xbf16> to vector<1x128x32xbf16>
    tpu.vector_store %arg6[%c3, %c0_17, %c0_18], %27 {strides = array<i32>} : memref<5x128x32xbf16, #tpu.memory_space<vmem>>, vector<1x128x32xbf16>,
    %28 = vector.extract_strided_slice %11 {offsets = [0, 128], sizes = [128, 32], strides = [1, 1]} : vector<128x160xbf16> to vector<128x32xbf16>
    %c4 = arith.constant 4 : index
    %c0_19 = arith.constant 0 : index
    %c0_20 = arith.constant 0 : index
    %29 = vector.load %arg6[%c4, %c0_19, %c0_20] : memref<5x128x32xbf16, #tpu.memory_space<vmem>>, vector<1x128x32xbf16>
    %30 = vector.shape_cast %29 : vector<1x128x32xbf16> to vector<128x32xbf16>
    %31 = vector.shape_cast %28 : vector<128x32xbf16> to vector<1x128x32xbf16>
    tpu.vector_store %arg6[%c4, %c0_19, %c0_20], %31 {strides = array<i32>} : memref<5x128x32xbf16, #tpu.memory_space<vmem>>, vector<1x128x32xbf16>,
    return
  }
  func.func @transform_0(%arg0: i32) -> (i32, i32) {
    %c0_i32 = arith.constant 0 : i32
    %c0_i32_0 = arith.constant 0 : i32
    return %arg0, %c0_i32 : i32, i32
  }
  func.func @transform_1(%arg0: i32) -> (i32, i32) {
    %c0_i32 = arith.constant 0 : i32
    %c0_i32_0 = arith.constant 0 : i32
    %c0_i32_1 = arith.constant 0 : i32
    return %c0_i32, %c0_i32_0 : i32, i32
  }
  func.func @transform_2(%arg0: i32) -> (i32, i32) {
    %c0_i32 = arith.constant 0 : i32
    %c0_i32_0 = arith.constant 0 : i32
    %c0_i32_1 = arith.constant 0 : i32
    return %c0_i32, %c0_i32_0 : i32, i32
  }
  func.func @transform_3(%arg0: i32) -> (i32, i32) {
    %c0_i32 = arith.constant 0 : i32
    %c0_i32_0 = arith.constant 0 : i32
    %c0_i32_1 = arith.constant 0 : i32
    return %c0_i32, %c0_i32_0 : i32, i32
  }
  func.func @transform_4(%arg0: i32) -> (i32, i32) {
    %c0_i32 = arith.constant 0 : i32
    %c0_i32_0 = arith.constant 0 : i32
    return %arg0, %c0_i32 : i32, i32
  }
  func.func @transform_5(%arg0: i32) -> (i32, i32, i32) {
    %c0_i32 = arith.constant 0 : i32
    %c0_i32_0 = arith.constant 0 : i32
    %c0_i32_1 = arith.constant 0 : i32
    return %c0_i32, %arg0, %c0_i32_0 : i32, i32, i32
  }
}

</mosaic_0001>

<bundles_post_ra>
// kernel: tpu_custom_call.1
= control target key start
LH: loop header
LB: loop body
LE: loop exit
PB: predicated region body
PF: predicated region fallthrough
CT: control target
= control target key end

     0   :  { %s1675_s18 = smov 0   ;;  %s1677_s19 = smov 0   ;;  %s2121_s0 = inlined_call_operand.vmem [shape: f32[256,8], index: 0, kind: input, shape index: {}]   ;;  %s2122_s1 = inlined_call_operand.vmem [shape: bf16[8,32], index: 1, kind: input, shape index: {}]   ;;  %s2123_s2 = inlined_call_operand.vmem [shape: f32[1,32], index: 2, kind: input, shape index: {}]   ;;  %s2124_s3 = inlined_call_operand.vmem [shape: bf16[32,160], index: 3, kind: input, shape index: {}]   ;;  %s2125_s4 = inlined_call_operand.vmem [shape: f32[256,32], index: 4, kind: output, shape index: {0}]   ;;  %s2126_s5 = inlined_call_operand.vmem [shape: bf16[5,256,32], index: 5, kind: output, shape index: {1}]  }
   0x1   :  { %s1679_s20 = smov 0  }
   0x2 LB: > { %s1688_s21 = sadd.s32 4294967295, %s1639_s20   ;;  %s1690_s22 = sadd.s32 1, %s1639_s20   ;;  %s1639_s20 = sphi %s1679_s20, %s2130_s20   ;;  %s1635_s19 = sphi %s1677_s19, %s2129_s19   ;;  %s1631_s18 = sphi %s1675_s18, %s2128_s18  }
   0x3   : > { %s135_s23 = ssub.s32 %s1639_s20, %s1690_s22  ;;  %s138_s24 = sadd.s32 1, %s1635_s19 }
   0x4   : > { %p136_p0 = scmp.eq.s32.totalorder %s135_s23, 0  ;;  %p148_p1 = scmp.ne.s32.totalorder %s1635_s19, %s1631_s18 }
   0x5   : > { %p149_p2 = scmp.eq.s32.totalorder %s1688_s21, 1  ;;  %p1391_p3 = scmp.ge.s32.totalorder %s1639_s20, 1 }
   0x6   : > { %s1698_s25 = scalar_select %p136_p0, %s1635_s19, %s138_s24  }
   0x7   : > { %p1700_p4 = por %p149_p2, %p148_p1  ;;  %p191_p5 = scmp.lt.s32.totalorder %s1639_s20, 3 }
   0x9   : > { %p192_p6 = pnand %p1391_p3, %p191_p5 }
   0xa   : > { %v261_v0 = vld [vmem:[%s2122_s1] sm:$0xf] (!%p192_p6)  ;;  %vm294_vm0 = vcmask (!%p192_p6), 1043456   ;;  %s1392_s29 = sshll.u32 (!%p192_p6), %s1688_s21, 4  ;;  %v1613_v2 = vld [vmem:[%s2124_s3 + $0x4] ss:$8 sps:$4 sm:$0xff] (!%p192_p6)  }
   0xb   : > { %195 = sbr.rel (%p192_p6) target bundleno = 676 (0x2a4), region = 36  ;;  %1581 = vmatprep.subr.msk.bf16.mxu0 (!%p192_p6), %vm294_vm0, %v261_v0  ;;  %v296_v1 = vsel (!%p192_p6), %vm294_vm0, %v261_v0, 0  ;;  %p224_p7 = scmp.lt.s32.totalorder (!%p192_p6), %s1392_s29, 31  ;;  %v1611_v3 = vld [vmem:[%s2124_s3] ss:$8 sps:$4 sm:$0xff] (!%p192_p6)   ;;  %1577 = vmatprep.subr.bf16.mxu1 (!%p192_p6), %v1613_v2  ;;  %vm269_vm1 = vcmask (!%p192_p6), 64512  }
   0xc   : > { %1560 = vmatpush3.bf16.msra.mxu0 (!%p192_p6), %v296_v1  ;;  %v1616_v4 = vld [vmem:[%s2124_s3 + $0x14] ss:$8 sps:$4 sm:$0xff] (!%p192_p6)   ;;  %1579 = vmatpush1.bf16.msra.mxu1 (!%p192_p6), %v1611_v3  ;;  %v1614_v5 = vld [vmem:[%s2124_s3 + $0x10] ss:$8 sps:$4 sm:$0xff] (!%p192_p6)   ;;  %v1641_v30 = vmov (!%p192_p6), 0   ;;  %vm395_vm2 = vcmask (!%p192_p6), 261120  }
   0xd   : > { %468 = vmatprep.subr.bf16.mxu0 (!%p192_p6), %v1613_v2  ;;  %1578 = vmatprep.subr.bf16.mxu1 (!%p192_p6), %v1616_v4  ;;  %v1396_v31 = vld [vmem:[%s2123_s2] ss:$0 sm:$0xff] (!%p192_p6)  ;;  %s220_s28 = sand.u32 (!%p192_p6), 1, %s1631_s18   ;;  %vm653_vm3 = vcmask (!%p192_p6), 257024   ;;  %s1642_s6 = smov (!%p192_p6), 96  }
   0xe   : > { %520 = vmatprep.mubr.bf16.mxu1 (!%p192_p6), %v1641_v30  ;;  %s1643_s18 = smov (!%p192_p6), 64   ;;  %s1644_s7 = smov (!%p192_p6), 32  }
  0x10   : > { %1580 = vmatpush1.bf16.msra.mxu1 (!%p192_p6), %v1614_v5 }
  0x12   : > { %s2132_s29 = smov (!%p224_p7, %s1392_s29), 31  ;;  %s1549_s8 = sshll.u32 (%p1700_p4), %s1688_s21, 6 }
  0x13   : > { %s1393_s11 = sshll.u32 %s2132_s29, 3  ;;  %s1582_s29 = smul.u32 320, %s220_s28 }
  0x14   : > { %s1725_s14 = scalar_lea.vmem %s2121_s0, %s1393_s11  ;;  %s1764_s27 = scalar_lea.vmem %s2125_s4, %s1393_s11 }
  0x15   : > { %v237_v6 = vld [vmem:[%s1725_s14] sm:$0xff]  ;;  %v238_v7 = vld [vmem:[%s1725_s14 + $0x8] sm:$0xff]  ;;  %v239_v8 = vld [vmem:[%s1725_s14 + $0x10] sm:$0xff]  ;;  %s1813_s30 = scalar_lea.vmem [#allocation2], %s1582_s29  ;;  %s2032_s11 = scalar_lea.vmem (%p1700_p4), %s2126_s5, %s1549_s8 }
  0x16   : > { %v253_v9 = vpack.c.bf16 %v238_v7, %v237_v6  ;;  %v240_v10 = vld [vmem:[%s1725_s14 + $0x18] sm:$0xff]  ;;  %v241_v11 = vld [vmem:[%s1725_s14 + $0x20] sm:$0xff]  ;;  %v242_v12 = vld [vmem:[%s1725_s14 + $0x28] sm:$0xff] }
  0x17   : > { %v254_v13 = vpack.c.bf16 %v240_v10, %v239_v8  ;;  %v255_v14 = vpack.c.bf16 %v242_v12, %v241_v11  ;;  %v243_v15 = vld [vmem:[%s1725_s14 + $0x30] sm:$0xff]  ;;  %v244_v16 = vld [vmem:[%s1725_s14 + $0x38] sm:$0xff]  ;;  %v245_v17 = vld [vmem:[%s1725_s14 + $0x40] sm:$0xff] }
  0x18   : > { %1561 = vmatprep.mubr.msk.bf16.mxu0 %vm269_vm1, %v253_v9  ;;  %v246_v18 = vld [vmem:[%s1725_s14 + $0x48] sm:$0xff]  ;;  %v256_v19 = vpack.c.bf16 %v244_v16, %v243_v15  ;;  %v247_v21 = vld [vmem:[%s1725_s14 + $0x50] sm:$0xff]  ;;  %v248_v22 = vld [vmem:[%s1725_s14 + $0x58] sm:$0xff] }
  0x19   : > { %1562 = vmatmul.mubr.msk.bf16.vlgmr.msra.gmra.mrb[0].mxu0 %vm269_vm1, %v254_v13  ;;  %v257_v20 = vpack.c.bf16 %v246_v18, %v245_v17  ;;  %v249_v23 = vld [vmem:[%s1725_s14 + $0x60] sm:$0xff]  ;;  %v250_v24 = vld [vmem:[%s1725_s14 + $0x68] sm:$0xff]  ;;  %v258_v25 = vpack.c.bf16 %v248_v22, %v247_v21  ;;  %v251_v27 = vld [vmem:[%s1725_s14 + $0x70] sm:$0xff] }
  0x1a   : > { %1565 = vmatprep.mubr.msk.bf16.mxu0 %vm269_vm1, %v255_v14  ;;  %469 = vmatpush1.bf16.msra.mxu0 %v1611_v3  ;;  %v259_v26 = vpack.c.bf16 %v250_v24, %v249_v23  ;;  %v252_v28 = vld [vmem:[%s1725_s14 + $0x78] sm:$0xff] }
  0x1b   : > { %470 = vmatprep.subr.bf16.mxu0 %v1616_v4  ;;  %v260_v29 = vpack.c.bf16 %v252_v28, %v251_v27 }
  0x1e   : > { %471 = vmatpush1.bf16.msra.mxu0 %v1614_v5 }
  0x21   : > { %1566 = vmatmul.mubr.msk.bf16.gmra.mrb[4].mxu0 %vm269_vm1, %v256_v19 }
  0x22   : > { %1569 = vmatprep.mubr.msk.bf16.mxu0 %vm269_vm1, %v257_v20 }
  0x29   : > { %1570 = vmatmul.mubr.msk.bf16.gmra.mrb[8].mxu0 %vm269_vm1, %v258_v25 }
  0x2a   : > { %1573 = vmatprep.mubr.msk.bf16.mxu0 %vm269_vm1, %v259_v26 }
  0x31   : > { %1574 = vmatmul.mubr.msk.bf16.gmra.mrb[12].mxu0 %vm269_vm1, %v260_v29 }
  0x32   : > { %500 = vmatprep.mubr.bf16.mxu0 %v1641_v30 }
  0xec   : > { %v1563_v32 = vpop.f32.mrb[0].mxu0 }
  0xed   : > { %v341_v33 = vadd.f32 %v1563_v32, %v1396_v31  ;;  %v332_v34 = vpop.f32.mrb[1].mxu0 }
  0xee   : > { %v333_v35 = vadd.f32 %v1396_v31, %v332_v34  ;;  %v1564_v36 = vpop.f32.mrb[2].mxu0 }
  0xef   : > { %398 = vst.msk [vmem:[%s1764_s27 + $0x10] sm:$0xff] %vm395_vm2, %v341_v33  ;;  %v344_v37 = vadd.f32 %v1564_v36, %v1396_v31  ;;  %v335_v38 = vpop.f32.mrb[3].mxu0 }
  0xf0   : > { %396 = vst.msk [vmem:[%s1764_s27] sm:$0xff] %vm395_vm2, %v333_v35  ;;  %v336_v39 = vadd.f32 %v1396_v31, %v335_v38 }
  0xf1   : > { %399 = vst.msk [vmem:[%s1764_s27 + $0x18] sm:$0xff] %vm395_vm2, %v344_v37  ;;  %v413_v40 = vpack.c.bf16 %v344_v37, %v341_v33 }
  0xf2   : > { %397 = vst.msk [vmem:[%s1764_s27 + $0x8] sm:$0xff] %vm395_vm2, %v336_v39  ;;  %v412_v41 = vpack.c.bf16 %v336_v39, %v333_v35 }
  0xf4   : > { %v1567_v42 = vpop.f32.mrb[4].mxu0  ;;  %1409 = vmatmul.mubr.msk.bf16.vlgmr.msra.gmra.mrb[16].mxu0 %vm395_vm2, %v412_v41 }
  0xf5   : > { %v357_v43 = vadd.f32 %v1567_v42, %v1396_v31  ;;  %v348_v44 = vpop.f32.mrb[5].mxu0  ;;  %510 = vmatprep.mubr.bf16.mxu0 %v1641_v30 }
  0xf6   : > { %v349_v45 = vadd.f32 %v1396_v31, %v348_v44  ;;  %v1568_v46 = vpop.f32.mrb[6].mxu0 }
  0xf7   : > { %402 = vst.msk [vmem:[%s1764_s27 + $0x30] sm:$0xff] %vm395_vm2, %v357_v43  ;;  %v360_v47 = vadd.f32 %v1568_v46, %v1396_v31  ;;  %v351_v48 = vpop.f32.mrb[7].mxu0 }
  0xf8   : > { %400 = vst.msk [vmem:[%s1764_s27 + $0x20] sm:$0xff] %vm395_vm2, %v349_v45  ;;  %v352_v49 = vadd.f32 %v1396_v31, %v351_v48 }
  0xf9   : > { %403 = vst.msk [vmem:[%s1764_s27 + $0x38] sm:$0xff] %vm395_vm2, %v360_v47  ;;  %v415_v50 = vpack.c.bf16 %v360_v47, %v357_v43 }
  0xfa   : > { %401 = vst.msk [vmem:[%s1764_s27 + $0x28] sm:$0xff] %vm395_vm2, %v352_v49  ;;  %v414_v51 = vpack.c.bf16 %v352_v49, %v349_v45 }
  0xfc   : > { %1410 = vmatmul.mubr.msk.bf16.gmra.mrb[20].mxu0 %vm395_vm2, %v413_v40  ;;  %1411 = vmatmul.mubr.msk.bf16.vlgmr.msra.gmra.mrb[0].mxu1 %vm395_vm2, %v414_v51  ;;  %v1571_v52 = vpop.f32.mrb[8].mxu0 }
  0xfd   : > { %530 = vmatprep.mubr.bf16.mxu1 %v1641_v30  ;;  %v373_v53 = vadd.f32 %v1571_v52, %v1396_v31  ;;  %v364_v54 = vpop.f32.mrb[9].mxu0 }
  0xfe   : > { %v365_v55 = vadd.f32 %v1396_v31, %v364_v54  ;;  %v1572_v56 = vpop.f32.mrb[10].mxu0 }
  0xff   : > { %406 = vst.msk [vmem:[%s1764_s27 + $0x50] sm:$0xff] %vm395_vm2, %v373_v53  ;;  %v376_v57 = vadd.f32 %v1572_v56, %v1396_v31  ;;  %v367_v58 = vpop.f32.mrb[11].mxu0 }
 0x100   : > { %404 = vst.msk [vmem:[%s1764_s27 + $0x40] sm:$0xff] %vm395_vm2, %v365_v55  ;;  %v368_v59 = vadd.f32 %v1396_v31, %v367_v58 }
 0x101   : > { %407 = vst.msk [vmem:[%s1764_s27 + $0x58] sm:$0xff] %vm395_vm2, %v376_v57  ;;  %v417_v60 = vpack.c.bf16 %v376_v57, %v373_v53 }
 0x102   : > { %405 = vst.msk [vmem:[%s1764_s27 + $0x48] sm:$0xff] %vm395_vm2, %v368_v59  ;;  %v416_v61 = vpack.c.bf16 %v368_v59, %v365_v55 }
 0x104   : > { %1412 = vmatmul.mubr.msk.bf16.gmra.mrb[4].mxu1 %vm395_vm2, %v415_v50  ;;  %v1575_v62 = vpop.f32.mrb[12].mxu0 }
 0x105   : > { %540 = vmatprep.mubr.bf16.mxu1 %v1641_v30  ;;  %v389_v63 = vadd.f32 %v1575_v62, %v1396_v31  ;;  %v380_v0 = vpop.f32.mrb[13].mxu0 }
 0x106   : > { %v381_v1 = vadd.f32 %v1396_v31, %v380_v0  ;;  %v1576_v2 = vpop.f32.mrb[14].mxu0 }
 0x107   : > { %410 = vst.msk [vmem:[%s1764_s27 + $0x70] sm:$0xff] %vm395_vm2, %v389_v63  ;;  %v392_v3 = vadd.f32 %v1576_v2, %v1396_v31  ;;  %v383_v4 = vpop.f32.mrb[15].mxu0 }
 0x108   : > { %408 = vst.msk [vmem:[%s1764_s27 + $0x60] sm:$0xff] %vm395_vm2, %v381_v1  ;;  %v384_v5 = vadd.f32 %v1396_v31, %v383_v4 }
 0x109   : > { %411 = vst.msk [vmem:[%s1764_s27 + $0x78] sm:$0xff] %vm395_vm2, %v392_v3  ;;  %v419_v6 = vpack.c.bf16 %v392_v3, %v389_v63 }
 0x10a   : > { %409 = vst.msk [vmem:[%s1764_s27 + $0x68] sm:$0xff] %vm395_vm2, %v384_v5  ;;  %v418_v7 = vpack.c.bf16 %v384_v5, %v381_v1 }
 0x10c   : > { %1413 = vmatmul.mubr.msk.bf16.gmra.mrb[8].mxu1 %vm395_vm2, %v416_v61 }
 0x10d   : > { %550 = vmatprep.mubr.bf16.mxu1 %v1641_v30 }
 0x114   : > { %1414 = vmatmul.mubr.msk.bf16.gmra.mrb[12].mxu1 %vm395_vm2, %v417_v60 }
 0x115   : > { %560 = vmatprep.mubr.bf16.mxu1 %v1641_v30 }
 0x11c   : > { %1415 = vmatmul.mubr.msk.bf16.gmra.mrb[16].mxu1 %vm395_vm2, %v418_v7 }
 0x11d   : > { %570 = vmatprep.mubr.bf16.mxu1 %v1641_v30 }
 0x124   : > { %1416 = vmatmul.mubr.msk.bf16.gmra.mrb[20].mxu1 %vm395_vm2, %v419_v6 }
 0x1c7   : > { %v502_v8 = vpop.f32.mrb[16].mxu0 }
 0x1c8   : > { %v1517_v9 = vpack.c.bf16 %v502_v8, %v502_v8  ;;  %v504_v10 = vpop.f32.mrb[17].mxu0 }
 0x1c9   : > { %v1533_v11 = vpack.c.bf16 %v504_v10, %v504_v10  ;;  %v506_v12 = vpop.f32.mrb[18].mxu0 }
 0x1ca   : > { %654 = vst.msk [vmem:[%s1813_s30] sm:$0xf] %vm653_vm3, %v1517_v9  ;;  %v1518_v13 = vpack.c.bf16 %v506_v12, %v506_v12  ;;  %670 = vrot.lane.b32.xlu0 %v1517_v9, %s1642_s6  ;;  %v508_v14 = vpop.f32.mrb[19].mxu0 }
 0x1cb   : > { %1497 = vst.msk [vmem:[%s1813_s30 + $0x100] sm:$0xf] %vm653_vm3, %v1533_v11  ;;  %v1534_v15 = vpack.c.bf16 %v508_v14, %v508_v14 }
 0x1cc   : > { %655 = vst.msk [vmem:[%s1813_s30 + $0x4] sm:$0xf] %vm653_vm3, %v1518_v13  ;;  %737 = vrot.lane.b32.xlu1 %v1518_v13, %s1643_s18 }
 0x1cd   : > { %1498 = vst.msk [vmem:[%s1813_s30 + $0x104] sm:$0xf] %vm653_vm3, %v1534_v15 }
 0x1ce   : > { %735 = vrot.lane.b32.xlu0 %v1517_v9, %s1643_s18 }
 0x1cf   : > { %v512_v16 = vpop.f32.mrb[20].mxu0  ;;  %v522_v17 = vpop.f32.mrb[0].mxu1 }
 0x1d0   : > { %v1519_v18 = vpack.c.bf16 %v512_v16, %v512_v16  ;;  %802 = vrot.lane.b32.xlu1 %v1518_v13, %s1644_s7  ;;  %v514_v19 = vpop.f32.mrb[21].mxu0  ;;  %v1521_v20 = vpack.c.bf16 %v522_v17, %v522_v17  ;;  %v524_v21 = vpop.f32.mrb[1].mxu1 }
 0x1d1   : > { %v1535_v22 = vpack.c.bf16 %v514_v19, %v514_v19  ;;  %v516_v23 = vpop.f32.mrb[22].mxu0  ;;  %v1537_v24 = vpack.c.bf16 %v524_v21, %v524_v21  ;;  %v526_v25 = vpop.f32.mrb[2].mxu1 }
 0x1d2   : > { %656 = vst.msk [vmem:[%s1813_s30 + $0x8] sm:$0xf] %vm653_vm3, %v1519_v18  ;;  %v1520_v26 = vpack.c.bf16 %v516_v23, %v516_v23  ;;  %658 = vst.msk [vmem:[%s1813_s30 + $0x10] sm:$0xf] %vm653_vm3, %v1521_v20  ;;  %800 = vrot.lane.b32.xlu0 %v1517_v9, %s1644_s7  ;;  %v518_v27 = vpop.f32.mrb[23].mxu0  ;;  %v1522_v28 = vpack.c.bf16 %v526_v25, %v526_v25  ;;  %v528_v29 = vpop.f32.mrb[3].mxu1 }
 0x1d3   : > { %1499 = vst.msk [vmem:[%s1813_s30 + $0x108] sm:$0xf] %vm653_vm3, %v1535_v22  ;;  %1501 = vst.msk [vmem:[%s1813_s30 + $0x110] sm:$0xf] %vm653_vm3, %v1537_v24  ;;  %v1536_v30 = vpack.c.bf16 %v518_v27, %v518_v27  ;;  %v1538_v31 = vpack.c.bf16 %v528_v29, %v528_v29 }
 0x1d4   : > { %657 = vst.msk [vmem:[%s1813_s30 + $0xc] sm:$0xf] %vm653_vm3, %v1520_v26  ;;  %659 = vst.msk [vmem:[%s1813_s30 + $0x14] sm:$0xf] %vm653_vm3, %v1522_v28  ;;  %674 = vrot.lane.b32.xlu1 %v1519_v18, %s1642_s6 }
 0x1d5   : > { %1500 = vst.msk [vmem:[%s1813_s30 + $0x10c] sm:$0xf] %vm653_vm3, %v1536_v30  ;;  %1502 = vst.msk [vmem:[%s1813_s30 + $0x114] sm:$0xf] %vm653_vm3, %v1538_v31 }
 0x1d6   : > { %672 = vrot.lane.b32.xlu0 %v1518_v13, %s1642_s6 }
 0x1d7   : > { %v532_v32 = vpop.f32.mrb[4].mxu1 }
 0x1d8   : > { %v1523_v33 = vpack.c.bf16 %v532_v32, %v532_v32  ;;  %v534_v34 = vpop.f32.mrb[5].mxu1  ;;  %676 = vrot.lane.b32.xlu1 %v1520_v26, %s1642_s6 }
 0x1d9   : > { %v1539_v35 = vpack.c.bf16 %v534_v34, %v534_v34  ;;  %v536_v36 = vpop.f32.mrb[6].mxu1 }
 0x1da   : > { %660 = vst.msk [vmem:[%s1813_s30 + $0x18] sm:$0xf] %vm653_vm3, %v1523_v33  ;;  %v1524_v37 = vpack.c.bf16 %v536_v36, %v536_v36  ;;  %v538_v38 = vpop.f32.mrb[7].mxu1  ;;  %678 = vrot.lane.b32.xlu0 %v1521_v20, %s1642_s6 }
 0x1db   : > { %1503 = vst.msk [vmem:[%s1813_s30 + $0x118] sm:$0xf] %vm653_vm3, %v1539_v35  ;;  %v1540_v39 = vpack.c.bf16 %v538_v38, %v538_v38 }
 0x1dc   : > { %661 = vst.msk [vmem:[%s1813_s30 + $0x1c] sm:$0xf] %vm653_vm3, %v1524_v37  ;;  %680 = vrot.lane.b32.xlu1 %v1522_v28, %s1642_s6 }
 0x1dd   : > { %1504 = vst.msk [vmem:[%s1813_s30 + $0x11c] sm:$0xf] %vm653_vm3, %v1540_v39 }
 0x1de   : > { %739 = vrot.lane.b32.xlu0 %v1519_v18, %s1643_s18 }
 0x1df   : > { %v542_v40 = vpop.f32.mrb[8].mxu1 }
 0x1e0   : > { %741 = vrot.lane.b32.xlu1 %v1520_v26, %s1643_s18  ;;  %v1525_v41 = vpack.c.bf16 %v542_v40, %v542_v40  ;;  %v544_v42 = vpop.f32.mrb[9].mxu1 }
 0x1e1   : > { %v1541_v43 = vpack.c.bf16 %v544_v42, %v544_v42  ;;  %v546_v44 = vpop.f32.mrb[10].mxu1 }
 0x1e2   : > { %743 = vrot.lane.b32.xlu0 %v1521_v20, %s1643_s18  ;;  %662 = vst.msk [vmem:[%s1813_s30 + $0x20] sm:$0xf] %vm653_vm3, %v1525_v41  ;;  %v1526_v45 = vpack.c.bf16 %v546_v44, %v546_v44  ;;  %v548_v46 = vpop.f32.mrb[11].mxu1 }
 0x1e3   : > { %1505 = vst.msk [vmem:[%s1813_s30 + $0x120] sm:$0xf] %vm653_vm3, %v1541_v43  ;;  %v1542_v47 = vpack.c.bf16 %v548_v46, %v548_v46 }
 0x1e4   : > { %745 = vrot.lane.b32.xlu1 %v1522_v28, %s1643_s18  ;;  %663 = vst.msk [vmem:[%s1813_s30 + $0x24] sm:$0xf] %vm653_vm3, %v1526_v45 }
 0x1e5   : > { %1506 = vst.msk [vmem:[%s1813_s30 + $0x124] sm:$0xf] %vm653_vm3, %v1542_v47 }
 0x1e6   : > { %804 = vrot.lane.b32.xlu0 %v1519_v18, %s1644_s7 }
 0x1e7   : > { %v552_v48 = vpop.f32.mrb[12].mxu1 }
 0x1e8   : > { %806 = vrot.lane.b32.xlu1 %v1520_v26, %s1644_s7  ;;  %v1527_v49 = vpack.c.bf16 %v552_v48, %v552_v48  ;;  %v554_v50 = vpop.f32.mrb[13].mxu1 }
 0x1e9   : > { %v1543_v51 = vpack.c.bf16 %v554_v50, %v554_v50  ;;  %v556_v52 = vpop.f32.mrb[14].mxu1 }
 0x1ea   : > { %808 = vrot.lane.b32.xlu0 %v1521_v20, %s1644_s7  ;;  %664 = vst.msk [vmem:[%s1813_s30 + $0x28] sm:$0xf] %vm653_vm3, %v1527_v49  ;;  %v1528_v53 = vpack.c.bf16 %v556_v52, %v556_v52  ;;  %v558_v54 = vpop.f32.mrb[15].mxu1 }
 0x1eb   : > { %1507 = vst.msk [vmem:[%s1813_s30 + $0x128] sm:$0xf] %vm653_vm3, %v1543_v51  ;;  %v1544_v55 = vpack.c.bf16 %v558_v54, %v558_v54 }
 0x1ec   : > { %810 = vrot.lane.b32.xlu1 %v1522_v28, %s1644_s7  ;;  %665 = vst.msk [vmem:[%s1813_s30 + $0x2c] sm:$0xf] %vm653_vm3, %v1528_v53 }
 0x1ed   : > { %1508 = vst.msk [vmem:[%s1813_s30 + $0x12c] sm:$0xf] %vm653_vm3, %v1544_v55 }
 0x1ee   : > { %682 = vrot.lane.b32.xlu0 %v1523_v33, %s1642_s6 }
 0x1ef   : > { %v562_v56 = vpop.f32.mrb[16].mxu1 }
 0x1f0   : > { %684 = vrot.lane.b32.xlu1 %v1524_v37, %s1642_s6  ;;  %v1529_v57 = vpack.c.bf16 %v562_v56, %v562_v56  ;;  %v564_v58 = vpop.f32.mrb[17].mxu1  ;;  %v972_v56 = vld [vmem:[%s1813_s30] sm:$0xff] (%p1700_p4)  }
 0x1f1   : > { %v1545_v59 = vpack.c.bf16 %v564_v58, %v564_v58  ;;  %v566_v60 = vpop.f32.mrb[18].mxu1  ;;  %v980_v58 = vld [vmem:[%s1813_s30 + $0x10] sm:$0xff] (%p1700_p4)   ;;  %973 = vst [vmem:[%s2032_s11] sm:$0xff] (%p1700_p4), %v972_v56  }
 0x1f2   : > { %747 = vrot.lane.b32.xlu0 %v1523_v33, %s1643_s18  ;;  %666 = vst.msk [vmem:[%s1813_s30 + $0x30] sm:$0xf] %vm653_vm3, %v1529_v57  ;;  %v1530_v61 = vpack.c.bf16 %v566_v60, %v566_v60  ;;  %v568_v62 = vpop.f32.mrb[19].mxu1  ;;  %v988_v60 = vld [vmem:[%s1813_s30 + $0x20] sm:$0xff] (%p1700_p4)   ;;  %981 = vst [vmem:[%s2032_s11 + $0x10] sm:$0xff] (%p1700_p4), %v980_v58  }
 0x1f3   : > { %1509 = vst.msk [vmem:[%s1813_s30 + $0x130] sm:$0xf] %vm653_vm3, %v1545_v59  ;;  %v1546_v63 = vpack.c.bf16 %v568_v62, %v568_v62  ;;  %v984_v59 = vld [vmem:[%s1813_s30 + $0x18] sm:$0xff] (%p1700_p4)   ;;  %989 = vst [vmem:[%s2032_s11 + $0x20] sm:$0xff] (%p1700_p4), %v988_v60  }
 0x1f4   : > { %749 = vrot.lane.b32.xlu1 %v1524_v37, %s1643_s18  ;;  %667 = vst.msk [vmem:[%s1813_s30 + $0x34] sm:$0xf] %vm653_vm3, %v1530_v61  ;;  %985 = vst [vmem:[%s2032_s11 + $0x18] sm:$0xff] (%p1700_p4), %v984_v59  }
 0x1f5   : > { %1510 = vst.msk [vmem:[%s1813_s30 + $0x134] sm:$0xf] %vm653_vm3, %v1546_v63 }
 0x1f6   : > { %812 = vrot.lane.b32.xlu0 %v1523_v33, %s1644_s7 }
 0x1f7   : > { %v572_v0 = vpop.f32.mrb[20].mxu1 }
 0x1f8   : > { %814 = vrot.lane.b32.xlu1 %v1524_v37, %s1644_s7  ;;  %v1531_v1 = vpack.c.bf16 %v572_v0, %v572_v0  ;;  %v574_v2 = vpop.f32.mrb[21].mxu1 }
 0x1f9   : > { %v1547_v3 = vpack.c.bf16 %v574_v2, %v574_v2  ;;  %v576_v4 = vpop.f32.mrb[22].mxu1 }
 0x1fa   : > { %686 = vrot.lane.b32.xlu0 %v1525_v41, %s1642_s6  ;;  %668 = vst.msk [vmem:[%s1813_s30 + $0x38] sm:$0xf] %vm653_vm3, %v1531_v1  ;;  %v1532_v5 = vpack.c.bf16 %v576_v4, %v576_v4  ;;  %v578_v6 = vpop.f32.mrb[23].mxu1 }
 0x1fb   : > { %1511 = vst.msk [vmem:[%s1813_s30 + $0x138] sm:$0xf] %vm653_vm3, %v1547_v3  ;;  %v1548_v7 = vpack.c.bf16 %v578_v6, %v578_v6  ;;  %v996_v62 = vld [vmem:[%s1813_s30 + $0x30] sm:$0xff] (%p1700_p4)  }
 0x1fc   : > { %688 = vrot.lane.b32.xlu1 %v1526_v45, %s1642_s6  ;;  %669 = vst.msk [vmem:[%s1813_s30 + $0x3c] sm:$0xf] %vm653_vm3, %v1532_v5  ;;  %997 = vst [vmem:[%s2032_s11 + $0x30] sm:$0xff] (%p1700_p4), %v996_v62  }
 0x1fd   : > { %1512 = vst.msk [vmem:[%s1813_s30 + $0x13c] sm:$0xf] %vm653_vm3, %v1548_v7 }
 0x1fe   : > { %751 = vrot.lane.b32.xlu0 %v1525_v41, %s1643_s18 }
 0x200   : > { %753 = vrot.lane.b32.xlu1 %v1526_v45, %s1643_s18 }
 0x202   : > { %816 = vrot.lane.b32.xlu0 %v1525_v41, %s1644_s7 }
 0x203   : > { %v1000_v63 = vld [vmem:[%s1813_s30 + $0x38] sm:$0xff] (%p1700_p4)  }
 0x204   : > { %818 = vrot.lane.b32.xlu1 %v1526_v45, %s1644_s7  ;;  %1001 = vst [vmem:[%s2032_s11 + $0x38] sm:$0xff] (%p1700_p4), %v1000_v63  }
 0x206   : > { %690 = vrot.lane.b32.xlu0 %v1527_v49, %s1642_s6 }
 0x208   : > { %692 = vrot.lane.b32.xlu1 %v1528_v53, %s1642_s6 }
 0x20a   : > { %755 = vrot.lane.b32.xlu0 %v1527_v49, %s1643_s18 }
 0x20c   : > { %757 = vrot.lane.b32.xlu1 %v1528_v53, %s1643_s18 }
 0x20e   : > { %820 = vrot.lane.b32.xlu0 %v1527_v49, %s1644_s7 }
 0x210   : > { %822 = vrot.lane.b32.xlu1 %v1528_v53, %s1644_s7 }
 0x212   : > { %694 = vrot.lane.b32.xlu0 %v1529_v57, %s1642_s6 }
 0x214   : > { %696 = vrot.lane.b32.xlu1 %v1530_v61, %s1642_s6 }
 0x216   : > { %759 = vrot.lane.b32.xlu0 %v1529_v57, %s1643_s18 }
 0x218   : > { %761 = vrot.lane.b32.xlu1 %v1530_v61, %s1643_s18 }
 0x21a   : > { %824 = vrot.lane.b32.xlu0 %v1529_v57, %s1644_s7  ;;  %v976_v57 = vld [vmem:[%s1813_s30 + $0x8] sm:$0xff] (%p1700_p4)  }
 0x21b   : > { %977 = vst [vmem:[%s2032_s11 + $0x8] sm:$0xff] (%p1700_p4), %v976_v57  }
 0x21c   : > { %826 = vrot.lane.b32.xlu1 %v1530_v61, %s1644_s7  ;;  %v992_v61 = vld [vmem:[%s1813_s30 + $0x28] sm:$0xff] (%p1700_p4)  }
 0x21d   : > { %993 = vst [vmem:[%s2032_s11 + $0x28] sm:$0xff] (%p1700_p4), %v992_v61  }
 0x21e   : > { %698 = vrot.lane.b32.xlu0 %v1531_v1, %s1642_s6 }
 0x220   : > { %700 = vrot.lane.b32.xlu1 %v1532_v5, %s1642_s6 }
 0x222   : > { %763 = vrot.lane.b32.xlu0 %v1531_v1, %s1643_s18 }
 0x224   : > { %765 = vrot.lane.b32.xlu1 %v1532_v5, %s1643_s18 }
 0x226   : > { %828 = vrot.lane.b32.xlu0 %v1531_v1, %s1644_s7 }
 0x228   : > { %830 = vrot.lane.b32.xlu1 %v1532_v5, %s1644_s7 }
 0x23c   : > { %v671_v8 = vpop.permute.xlu0 %670 }
 0x23d   : > { %1433 = vst.msk [vmem:[%s1813_s30 + $0x40] sm:$0xf] %vm653_vm3, %v671_v8 }
 0x23e   : > { %v738_v9 = vpop.permute.xlu1 %737 }
 0x23f   : > { %1450 = vst.msk [vmem:[%s1813_s30 + $0x84] sm:$0xf] %vm653_vm3, %v738_v9 }
 0x240   : > { %v736_v10 = vpop.permute.xlu0 %735 }
 0x241   : > { %1449 = vst.msk [vmem:[%s1813_s30 + $0x80] sm:$0xf] %vm653_vm3, %v736_v10 }
 0x242   : > { %v803_v11 = vpop.permute.xlu1 %802 }
 0x243   : > { %1466 = vst.msk [vmem:[%s1813_s30 + $0xc4] sm:$0xf] %vm653_vm3, %v803_v11 }
 0x244   : > { %v801_v12 = vpop.permute.xlu0 %800 }
 0x245   : > { %1465 = vst.msk [vmem:[%s1813_s30 + $0xc0] sm:$0xf] %vm653_vm3, %v801_v12 }
 0x246   : > { %v675_v13 = vpop.permute.xlu1 %674 }
 0x247   : > { %1435 = vst.msk [vmem:[%s1813_s30 + $0x48] sm:$0xf] %vm653_vm3, %v675_v13 }
 0x248   : > { %v673_v14 = vpop.permute.xlu0 %672  ;;  %v1036_v8 = vld [vmem:[%s1813_s30 + $0x80] sm:$0xff] (%p1700_p4)  }
 0x249   : > { %1434 = vst.msk [vmem:[%s1813_s30 + $0x44] sm:$0xf] %vm653_vm3, %v673_v14  ;;  %1037 = vst [vmem:[%s2032_s11 + $0x100] sm:$0xff] (%p1700_p4), %v1036_v8  }
 0x24a   : > { %v677_v15 = vpop.permute.xlu1 %676 }
 0x24b   : > { %1436 = vst.msk [vmem:[%s1813_s30 + $0x4c] sm:$0xf] %vm653_vm3, %v677_v15 }
 0x24c   : > { %v679_v16 = vpop.permute.xlu0 %678 }
 0x24d   : > { %1437 = vst.msk [vmem:[%s1813_s30 + $0x50] sm:$0xf] %vm653_vm3, %v679_v16  ;;  %v1068_v16 = vld [vmem:[%s1813_s30 + $0xc0] sm:$0xff] (%p1700_p4)  }
 0x24e   : > { %v681_v17 = vpop.permute.xlu1 %680  ;;  %1069 = vst [vmem:[%s2032_s11 + $0x180] sm:$0xff] (%p1700_p4), %v1068_v16  }
 0x24f   : > { %1438 = vst.msk [vmem:[%s1813_s30 + $0x54] sm:$0xf] %vm653_vm3, %v681_v17 }
 0x250   : > { %v740_v18 = vpop.permute.xlu0 %739  ;;  %v1004_v0 = vld [vmem:[%s1813_s30 + $0x40] sm:$0xff] (%p1700_p4)  }
 0x251   : > { %1451 = vst.msk [vmem:[%s1813_s30 + $0x88] sm:$0xf] %vm653_vm3, %v740_v18  ;;  %1005 = vst [vmem:[%s2032_s11 + $0x80] sm:$0xff] (%p1700_p4), %v1004_v0  }
 0x252   : > { %v742_v19 = vpop.permute.xlu1 %741  ;;  %v1008_v1 = vld [vmem:[%s1813_s30 + $0x48] sm:$0xff] (%p1700_p4)  }
 0x253   : > { %1452 = vst.msk [vmem:[%s1813_s30 + $0x8c] sm:$0xf] %vm653_vm3, %v742_v19  ;;  %1009 = vst [vmem:[%s2032_s11 + $0x88] sm:$0xff] (%p1700_p4), %v1008_v1  }
 0x254   : > { %v744_v20 = vpop.permute.xlu0 %743 }
 0x255   : > { %1453 = vst.msk [vmem:[%s1813_s30 + $0x90] sm:$0xf] %vm653_vm3, %v744_v20 }
 0x256   : > { %v746_v21 = vpop.permute.xlu1 %745  ;;  %v1012_v2 = vld [vmem:[%s1813_s30 + $0x50] sm:$0xff] (%p1700_p4)  }
 0x257   : > { %1454 = vst.msk [vmem:[%s1813_s30 + $0x94] sm:$0xf] %vm653_vm3, %v746_v21  ;;  %1013 = vst [vmem:[%s2032_s11 + $0x90] sm:$0xff] (%p1700_p4), %v1012_v2  }
 0x258   : > { %v805_v22 = vpop.permute.xlu0 %804 }
 0x259   : > { %1467 = vst.msk [vmem:[%s1813_s30 + $0xc8] sm:$0xf] %vm653_vm3, %v805_v22 }
 0x25a   : > { %v807_v23 = vpop.permute.xlu1 %806  ;;  %v1040_v9 = vld [vmem:[%s1813_s30 + $0x88] sm:$0xff] (%p1700_p4)  }
 0x25b   : > { %1468 = vst.msk [vmem:[%s1813_s30 + $0xcc] sm:$0xf] %vm653_vm3, %v807_v23  ;;  %1041 = vst [vmem:[%s2032_s11 + $0x108] sm:$0xff] (%p1700_p4), %v1040_v9  }
 0x25c   : > { %v809_v24 = vpop.permute.xlu0 %808 }
 0x25d   : > { %1469 = vst.msk [vmem:[%s1813_s30 + $0xd0] sm:$0xf] %vm653_vm3, %v809_v24  ;;  %v1100_v24 = vld [vmem:[%s1813_s30 + $0x100] sm:$0xff] (%p1700_p4)  }
 0x25e   : > { %v811_v25 = vpop.permute.xlu1 %810  ;;  %v1044_v10 = vld [vmem:[%s1813_s30 + $0x90] sm:$0xff] (%p1700_p4)   ;;  %1101 = vst [vmem:[%s2032_s11 + $0x200] sm:$0xff] (%p1700_p4), %v1100_v24  }
 0x25f   : > { %1470 = vst.msk [vmem:[%s1813_s30 + $0xd4] sm:$0xf] %vm653_vm3, %v811_v25  ;;  %1045 = vst [vmem:[%s2032_s11 + $0x110] sm:$0xff] (%p1700_p4), %v1044_v10   ;;  %v1104_v25 = vld [vmem:[%s1813_s30 + $0x108] sm:$0xff] (%p1700_p4)  }
 0x260   : > { %v683_v26 = vpop.permute.xlu0 %682  ;;  %1105 = vst [vmem:[%s2032_s11 + $0x208] sm:$0xff] (%p1700_p4), %v1104_v25  }
 0x261   : > { %1439 = vst.msk [vmem:[%s1813_s30 + $0x58] sm:$0xf] %vm653_vm3, %v683_v26  ;;  %v1108_v26 = vld [vmem:[%s1813_s30 + $0x110] sm:$0xff] (%p1700_p4)  }
 0x262   : > { %v685_v27 = vpop.permute.xlu1 %684  ;;  %v1072_v17 = vld [vmem:[%s1813_s30 + $0xc8] sm:$0xff] (%p1700_p4)   ;;  %1109 = vst [vmem:[%s2032_s11 + $0x210] sm:$0xff] (%p1700_p4), %v1108_v26  }
 0x263   : > { %1440 = vst.msk [vmem:[%s1813_s30 + $0x5c] sm:$0xf] %vm653_vm3, %v685_v27  ;;  %1073 = vst [vmem:[%s2032_s11 + $0x188] sm:$0xff] (%p1700_p4), %v1072_v17   ;;  %v1112_v27 = vld [vmem:[%s1813_s30 + $0x118] sm:$0xff] (%p1700_p4)  }
 0x264   : > { %v748_v28 = vpop.permute.xlu0 %747  ;;  %1113 = vst [vmem:[%s2032_s11 + $0x218] sm:$0xff] (%p1700_p4), %v1112_v27  }
 0x265   : > { %1455 = vst.msk [vmem:[%s1813_s30 + $0x98] sm:$0xf] %vm653_vm3, %v748_v28  ;;  %v1116_v28 = vld [vmem:[%s1813_s30 + $0x120] sm:$0xff] (%p1700_p4)  }
 0x266   : > { %v750_v29 = vpop.permute.xlu1 %749  ;;  %v1076_v18 = vld [vmem:[%s1813_s30 + $0xd0] sm:$0xff] (%p1700_p4)   ;;  %1117 = vst [vmem:[%s2032_s11 + $0x220] sm:$0xff] (%p1700_p4), %v1116_v28  }
 0x267   : > { %1456 = vst.msk [vmem:[%s1813_s30 + $0x9c] sm:$0xf] %vm653_vm3, %v750_v29  ;;  %1077 = vst [vmem:[%s2032_s11 + $0x190] sm:$0xff] (%p1700_p4), %v1076_v18   ;;  %v1120_v29 = vld [vmem:[%s1813_s30 + $0x128] sm:$0xff] (%p1700_p4)  }
 0x268   : > { %v813_v30 = vpop.permute.xlu0 %812  ;;  %1121 = vst [vmem:[%s2032_s11 + $0x228] sm:$0xff] (%p1700_p4), %v1120_v29  }
 0x269   : > { %1471 = vst.msk [vmem:[%s1813_s30 + $0xd8] sm:$0xf] %vm653_vm3, %v813_v30  ;;  %v1124_v30 = vld [vmem:[%s1813_s30 + $0x130] sm:$0xff] (%p1700_p4)  }
 0x26a   : > { %v815_v31 = vpop.permute.xlu1 %814  ;;  %v1016_v3 = vld [vmem:[%s1813_s30 + $0x58] sm:$0xff] (%p1700_p4)   ;;  %1125 = vst [vmem:[%s2032_s11 + $0x230] sm:$0xff] (%p1700_p4), %v1124_v30  }
 0x26b   : > { %1472 = vst.msk [vmem:[%s1813_s30 + $0xdc] sm:$0xf] %vm653_vm3, %v815_v31  ;;  %1017 = vst [vmem:[%s2032_s11 + $0x98] sm:$0xff] (%p1700_p4), %v1016_v3   ;;  %v1128_v31 = vld [vmem:[%s1813_s30 + $0x138] sm:$0xff] (%p1700_p4)  }
 0x26c   : > { %v687_v32 = vpop.permute.xlu0 %686  ;;  %1129 = vst [vmem:[%s2032_s11 + $0x238] sm:$0xff] (%p1700_p4), %v1128_v31  }
 0x26d   : > { %1441 = vst.msk [vmem:[%s1813_s30 + $0x60] sm:$0xf] %vm653_vm3, %v687_v32 }
 0x26e   : > { %v689_v33 = vpop.permute.xlu1 %688  ;;  %v1048_v11 = vld [vmem:[%s1813_s30 + $0x98] sm:$0xff] (%p1700_p4)  }
 0x26f   : > { %1442 = vst.msk [vmem:[%s1813_s30 + $0x64] sm:$0xf] %vm653_vm3, %v689_v33  ;;  %1049 = vst [vmem:[%s2032_s11 + $0x118] sm:$0xff] (%p1700_p4), %v1048_v11  }
 0x270   : > { %v752_v34 = vpop.permute.xlu0 %751 }
 0x271   : > { %1457 = vst.msk [vmem:[%s1813_s30 + $0xa0] sm:$0xf] %vm653_vm3, %v752_v34 }
 0x272   : > { %v754_v35 = vpop.permute.xlu1 %753  ;;  %v1080_v19 = vld [vmem:[%s1813_s30 + $0xd8] sm:$0xff] (%p1700_p4)  }
 0x273   : > { %1458 = vst.msk [vmem:[%s1813_s30 + $0xa4] sm:$0xf] %vm653_vm3, %v754_v35  ;;  %1081 = vst [vmem:[%s2032_s11 + $0x198] sm:$0xff] (%p1700_p4), %v1080_v19  }
 0x274   : > { %v817_v36 = vpop.permute.xlu0 %816 }
 0x275   : > { %1473 = vst.msk [vmem:[%s1813_s30 + $0xe0] sm:$0xf] %vm653_vm3, %v817_v36 }
 0x276   : > { %v819_v37 = vpop.permute.xlu1 %818  ;;  %v1020_v4 = vld [vmem:[%s1813_s30 + $0x60] sm:$0xff] (%p1700_p4)  }
 0x277   : > { %1474 = vst.msk [vmem:[%s1813_s30 + $0xe4] sm:$0xf] %vm653_vm3, %v819_v37  ;;  %1021 = vst [vmem:[%s2032_s11 + $0xa0] sm:$0xff] (%p1700_p4), %v1020_v4  }
 0x278   : > { %v691_v38 = vpop.permute.xlu0 %690 }
 0x279   : > { %1443 = vst.msk [vmem:[%s1813_s30 + $0x68] sm:$0xf] %vm653_vm3, %v691_v38 }
 0x27a   : > { %v693_v39 = vpop.permute.xlu1 %692  ;;  %v1052_v12 = vld [vmem:[%s1813_s30 + $0xa0] sm:$0xff] (%p1700_p4)  }
 0x27b   : > { %1444 = vst.msk [vmem:[%s1813_s30 + $0x6c] sm:$0xf] %vm653_vm3, %v693_v39  ;;  %1053 = vst [vmem:[%s2032_s11 + $0x120] sm:$0xff] (%p1700_p4), %v1052_v12  }
 0x27c   : > { %v756_v40 = vpop.permute.xlu0 %755 }
 0x27d   : > { %1459 = vst.msk [vmem:[%s1813_s30 + $0xa8] sm:$0xf] %vm653_vm3, %v756_v40 }
 0x27e   : > { %v758_v41 = vpop.permute.xlu1 %757  ;;  %v1084_v20 = vld [vmem:[%s1813_s30 + $0xe0] sm:$0xff] (%p1700_p4)  }
 0x27f   : > { %1460 = vst.msk [vmem:[%s1813_s30 + $0xac] sm:$0xf] %vm653_vm3, %v758_v41  ;;  %1085 = vst [vmem:[%s2032_s11 + $0x1a0] sm:$0xff] (%p1700_p4), %v1084_v20  }
 0x280   : > { %v821_v42 = vpop.permute.xlu0 %820 }
 0x281   : > { %1475 = vst.msk [vmem:[%s1813_s30 + $0xe8] sm:$0xf] %vm653_vm3, %v821_v42 }
 0x282   : > { %v823_v43 = vpop.permute.xlu1 %822  ;;  %v1024_v5 = vld [vmem:[%s1813_s30 + $0x68] sm:$0xff] (%p1700_p4)  }
 0x283   : > { %1476 = vst.msk [vmem:[%s1813_s30 + $0xec] sm:$0xf] %vm653_vm3, %v823_v43  ;;  %1025 = vst [vmem:[%s2032_s11 + $0xa8] sm:$0xff] (%p1700_p4), %v1024_v5  }
 0x284   : > { %v695_v44 = vpop.permute.xlu0 %694 }
 0x285   : > { %1445 = vst.msk [vmem:[%s1813_s30 + $0x70] sm:$0xf] %vm653_vm3, %v695_v44 }
 0x286   : > { %v697_v45 = vpop.permute.xlu1 %696  ;;  %v1056_v13 = vld [vmem:[%s1813_s30 + $0xa8] sm:$0xff] (%p1700_p4)  }
 0x287   : > { %1446 = vst.msk [vmem:[%s1813_s30 + $0x74] sm:$0xf] %vm653_vm3, %v697_v45  ;;  %1057 = vst [vmem:[%s2032_s11 + $0x128] sm:$0xff] (%p1700_p4), %v1056_v13  }
 0x288   : > { %v760_v46 = vpop.permute.xlu0 %759 }
 0x289   : > { %1461 = vst.msk [vmem:[%s1813_s30 + $0xb0] sm:$0xf] %vm653_vm3, %v760_v46 }
 0x28a   : > { %v762_v47 = vpop.permute.xlu1 %761  ;;  %v1088_v21 = vld [vmem:[%s1813_s30 + $0xe8] sm:$0xff] (%p1700_p4)  }
 0x28b   : > { %1462 = vst.msk [vmem:[%s1813_s30 + $0xb4] sm:$0xf] %vm653_vm3, %v762_v47  ;;  %1089 = vst [vmem:[%s2032_s11 + $0x1a8] sm:$0xff] (%p1700_p4), %v1088_v21  }
 0x28c   : > { %v825_v48 = vpop.permute.xlu0 %824 }
 0x28d   : > { %1477 = vst.msk [vmem:[%s1813_s30 + $0xf0] sm:$0xf] %vm653_vm3, %v825_v48 }
 0x28e   : > { %v827_v49 = vpop.permute.xlu1 %826  ;;  %v1028_v6 = vld [vmem:[%s1813_s30 + $0x70] sm:$0xff] (%p1700_p4)  }
 0x28f   : > { %1478 = vst.msk [vmem:[%s1813_s30 + $0xf4] sm:$0xf] %vm653_vm3, %v827_v49  ;;  %1029 = vst [vmem:[%s2032_s11 + $0xb0] sm:$0xff] (%p1700_p4), %v1028_v6  }
 0x290   : > { %v699_v50 = vpop.permute.xlu0 %698 }
 0x291   : > { %1447 = vst.msk [vmem:[%s1813_s30 + $0x78] sm:$0xf] %vm653_vm3, %v699_v50 }
 0x292   : > { %v701_v51 = vpop.permute.xlu1 %700  ;;  %v1060_v14 = vld [vmem:[%s1813_s30 + $0xb0] sm:$0xff] (%p1700_p4)  }
 0x293   : > { %1448 = vst.msk [vmem:[%s1813_s30 + $0x7c] sm:$0xf] %vm653_vm3, %v701_v51  ;;  %1061 = vst [vmem:[%s2032_s11 + $0x130] sm:$0xff] (%p1700_p4), %v1060_v14  }
 0x294   : > { %v764_v52 = vpop.permute.xlu0 %763 }
 0x295   : > { %1463 = vst.msk [vmem:[%s1813_s30 + $0xb8] sm:$0xf] %vm653_vm3, %v764_v52  ;;  %953 = sbr.rel (!%p1700_p4) target bundleno = 676 (0x2a4), region = 44 }
 0x296   : > { %v766_v53 = vpop.permute.xlu1 %765  ;;  %v1092_v22 = vld [vmem:[%s1813_s30 + $0xf0] sm:$0xff] (%p1700_p4)  }
 0x297   : > { %1464 = vst.msk [vmem:[%s1813_s30 + $0xbc] sm:$0xf] %vm653_vm3, %v766_v53  ;;  %1093 = vst [vmem:[%s2032_s11 + $0x1b0] sm:$0xff] (%p1700_p4), %v1092_v22  }
 0x298   : > { %v829_v54 = vpop.permute.xlu0 %828 }
 0x299   : > { %1479 = vst.msk [vmem:[%s1813_s30 + $0xf8] sm:$0xf] %vm653_vm3, %v829_v54 }
 0x29a   : > { %v831_v55 = vpop.permute.xlu1 %830  ;;  %v1032_v7 = vld [vmem:[%s1813_s30 + $0x78] sm:$0xff] (%p1700_p4)  }
 0x29b   : > { %1480 = vst.msk [vmem:[%s1813_s30 + $0xfc] sm:$0xf] %vm653_vm3, %v831_v55  ;;  %1033 = vst [vmem:[%s2032_s11 + $0xb8] sm:$0xff] (%p1700_p4), %v1032_v7  }
 0x29e   : > { %v1064_v15 = vld [vmem:[%s1813_s30 + $0xb8] sm:$0xff]  }
 0x29f   : > { %1065 = vst [vmem:[%s2032_s11 + $0x138] sm:$0xff] %v1064_v15  }
 0x2a2   : > { %v1096_v23 = vld [vmem:[%s1813_s30 + $0xf8] sm:$0xff]  }
 0x2a3   : > { %1097 = vst [vmem:[%s2032_s11 + $0x1b8] sm:$0xff] %v1096_v23  }
 0x2a4 PF: > { %p13_p8 = scmp.ge.s32.totalorder %s1690_s22, 4   ;;  %s2128_s18 = smov %s1635_s19 }
 0x2a5   : > { %s2129_s19 = smov %s1698_s25  ;;  %s2130_s20 = smov %s1690_s22 }
 0x2a6   :  { %15 = sbr.rel (!%p13_p8) target bundleno = 2 (0x2), region = 123 }

</bundles_post_ra>
